<compile_context>
chip_gen: v6e
topology: v6e:2x2x1
jax: 0.10.0
libtpu: 0.0.40
codegen_flags: <defaults>
</compile_context>

<pallas_src>
import math

import jax
import jax.numpy as jnp
from jax.experimental import pallas as pl
from jax.experimental.pallas import tpu as pltpu


def _sqrt_kernel(x_ref, o_ref):
    # Whole-tile elementwise sqrt (EUP); kernel is DMA-bound, compute is free.
    o_ref[...] = jnp.sqrt(x_ref[...])


# ~2 MiB per block.  Double-buffered input + output => ~4x block bytes live in
# VMEM (~8 MiB), well under the scoped VMEM limit on every TPU generation.
_TARGET_BLOCK_BYTES = 2 * 1024 * 1024
# Safe on v5e/v6e (128 MiB physical) and v7x (64 MiB physical).
_VMEM_LIMIT_BYTES = 32 * 1024 * 1024


def _choose_2d_layout(total: int, last_dim: int):
    """Pick a lane-dense (rows, lane) factorization of `total` if possible.

    Prefers lane widths that are multiples of 128 (unmasked, full-lane stores)
    and row counts that are multiples of 8 (sublane-dense vregs).  Falls back
    to the original (rows, W) layout only when no multiple-of-128 divisor
    exists (full-extent lane blocks remain legal even when W < 128).
    """
    candidates = (4096, 2048, 1024, 512, 256, 128)
    divisors = [c for c in candidates if total % c == 0]
    if divisors:
        # Best: widest lane leaving a multiple-of-8 number of rows (>= 8).
        for c in divisors:
            rows = total // c
            if rows >= 8 and rows % 8 == 0:
                return rows, c
        # Next best: at least 8 rows.
        for c in divisors:
            rows = total // c
            if rows >= 8:
                return rows, c
        # Tiny tensor: take the widest lane-dense factorization.
        c = divisors[0]
        return total // c, c
    # Fallback: no multiple-of-128 divisor; keep W as the lane dim.
    return total // last_dim, last_dim


def _choose_tile_rows(rows: int, lane: int, itemsize: int) -> int:
    """Byte-targeted row tiling (multiple of 8 whenever rows allow it)."""
    if rows < 8:
        return rows  # full-extent block on the sublane dim is always legal
    bytes_per_row = lane * itemsize
    t = min(rows, max(8, _TARGET_BLOCK_BYTES // bytes_per_row))
    t -= t % 8
    return max(t, 8)


def sqrt_pallas(x: jax.Array) -> jax.Array:
    assert x.ndim == 4, "expected rank-4 input (N, C, H, W)"
    orig_shape = x.shape
    total = math.prod(orig_shape)
    itemsize = jnp.dtype(x.dtype).itemsize

    rows, lane = _choose_2d_layout(total, orig_shape[-1])
    x2d = x.reshape(rows, lane)

    tile_rows = _choose_tile_rows(rows, lane, itemsize)
    grid = (pl.cdiv(rows, tile_rows),)  # partial last block handled by Pallas

    out2d = pl.pallas_call(
        _sqrt_kernel,
        out_shape=jax.ShapeDtypeStruct((rows, lane), x.dtype),
        grid_spec=pltpu.PrefetchScalarGridSpec(
            num_scalar_prefetch=0,
            grid=grid,
            in_specs=[pl.BlockSpec((tile_rows, lane), lambda i: (i, 0))],
            out_specs=pl.BlockSpec((tile_rows, lane), lambda i: (i, 0)),
        ),
        compiler_params=pltpu.CompilerParams(
            dimension_semantics=("parallel",),   # lets v7x shard across 2 TCs
            vmem_limit_bytes=_VMEM_LIMIT_BYTES,
        ),
    )(x2d)

    return out2d.reshape(orig_shape)


if __name__ == "__main__":
    key = jax.random.PRNGKey(0)
    # Small rank-4 shape consistent with the module's R4 F32 input.
    x = jax.random.uniform(
        key, (2, 4, 16, 16), dtype=jnp.float32, minval=0.0, maxval=10.0
    )

    y = sqrt_pallas(x)
    jax.block_until_ready(y)

    # Correctness check against torch.sqrt semantics (float32).
    y_ref = jnp.sqrt(x)
    assert y.shape == x.shape and y.dtype == x.dtype
    assert jnp.allclose(y, y_ref, rtol=1e-6, atol=1e-6)

    print("KERNEL_OK")
</pallas_src>

<mosaic_0001>
module attributes {stable_mosaic.version = 11 : i64} {
  func.func @_sqrt_kernel(%arg0: i32, %arg1: memref<8x256xf32, #tpu.memory_space<vmem>>, %arg2: memref<8x256xf32, #tpu.memory_space<vmem>>) attributes {dimension_semantics = [#tpu.dimension_semantics<parallel>], iteration_bounds = array<i64: 1>, scalar_prefetch = 0 : i64, scratch_operands = 0 : i64, tpu.core_type = #tpu.core_type<tc>, window_params = [{transform_indices = @transform_0, window_bounds = array<i64: 8, 256>}, {transform_indices = @transform_1, window_bounds = array<i64: 8, 256>}]} {
    %c0 = arith.constant 0 : index
    %c0_0 = arith.constant 0 : index
    %0 = vector.load %arg1[%c0, %c0_0] : memref<8x256xf32, #tpu.memory_space<vmem>>, vector<8x256xf32>
    %1 = math.sqrt %0 : vector<8x256xf32>
    %c0_1 = arith.constant 0 : index
    %c0_2 = arith.constant 0 : index
    %2 = vector.load %arg2[%c0_1, %c0_2] : memref<8x256xf32, #tpu.memory_space<vmem>>, vector<8x256xf32>
    tpu.vector_store %arg2[%c0_1, %c0_2], %1 {strides = array<i32>} : memref<8x256xf32, #tpu.memory_space<vmem>>, vector<8x256xf32>,
    return
  }
  func.func @transform_0(%arg0: i32) -> (i32, i32) {
    %c0_i32 = arith.constant 0 : i32
    %c0_i32_0 = arith.constant 0 : i32
    return %arg0, %c0_i32 : i32, i32
  }
  func.func @transform_1(%arg0: i32) -> (i32, i32) {
    %c0_i32 = arith.constant 0 : i32
    %c0_i32_0 = arith.constant 0 : i32
    return %arg0, %c0_i32 : i32, i32
  }
}

</mosaic_0001>

<bundles_post_ra>
// kernel: tpu_custom_call.1
= control target key start
LH: loop header
LB: loop body
LE: loop exit
PB: predicated region body
PF: predicated region fallthrough
CT: control target
= control target key end

     0   :  { %6 = vsyncpa [#allocation3], 0  ;;  %s122_s0 = inlined_call_operand.hbm [shape: f32[8,256], index: 0, kind: input, shape index: {}]   ;;  %s123_s1 = inlined_call_operand.hbm [shape: f32[8,256], index: 1, kind: output, shape index: {}]  }
   0x1   :  { %7 = vsyncpa [#allocation4], 0  ;;  %s104_s6 = smov [#allocation2]  }
   0x2   :  { %s14_s7 = sshll.u32 %s104_s6, 4  ;;  %s15_s7 = int_to_ptr.vmem [resolvable:$true] %s14_s7 }
   0x3   :  { %s68_s8 = scalar_lea.vmem %s15_s7, 256  ;;  %p73_p1 = scmp.lt.s32.totalorder %s15_s7, %s15_s7 }
   0x4   :  { %p69_p0 = scmp.ne.s32.totalorder %s15_s7, %s68_s8  ;;  %p74_p2 = scmp.lt.s32.totalorder %s68_s8, %s68_s8 }
   0x6   :  { %p75_p3 = por %p74_p2, %p73_p1 }
   0x8   :  { %p76_p4 = pnand %p75_p3, %p69_p0 }
   0xa   :  { %79 = shalt.err (!%p76_p4)
}
   0xb   :  { %17 = dma.hbm_to_vmem [thread:$0]  %s122_s0, 256, %s15_s7, [#allocation3]  }
   0xc   :  { %100 = dma.done.wait [#allocation3], 256  }
   0xd   :  { %101 = vsyncadd [#allocation3], 4294967040  ;;  %v21_v0 = vld [vmem:[#allocation2] sm:$0xff]  ;;  %v22_v1 = vld [vmem:[#allocation2 + $0x8] sm:$0xff]  ;;  %s105_s11 = smov [#allocation5]  }
   0xe   :  { %56 = vrsqrt.f32 %v21_v0  ;;  %vm25_vm0 = vcmp.eq.f32.partialorder %v21_v0, inf  ;;  %v28_v3 = vand.u32 2147483648, %v21_v0  ;;  %vm27_vm1 = vcmp.eq.f32.partialorder %v21_v0, 0.0  ;;  %s45_s12 = sshll.u32 %s105_s11, 4  ;;  %s46_s12 = int_to_ptr.vmem [resolvable:$true] %s45_s12 }
   0xf   :  { %58 = vrsqrt.f32 %v22_v1  ;;  %vm32_vm2 = vcmp.eq.f32.partialorder %v22_v1, inf  ;;  %v35_v6 = vand.u32 2147483648, %v22_v1  ;;  %vm34_vm3 = vcmp.eq.f32.partialorder %v22_v1, 0.0  ;;  %s80_s0 = scalar_lea.vmem %s46_s12, 256  ;;  %p85_p6 = scmp.lt.s32.totalorder %s46_s12, %s46_s12 }
  0x10   :  { %p81_p5 = scmp.ne.s32.totalorder %s46_s12, %s80_s0  ;;  %p86_p7 = scmp.lt.s32.totalorder %s80_s0, %s80_s0 }
  0x12   :  { %p87_p8 = por %p86_p7, %p85_p6 }
  0x14   :  { %p88_p9 = pnand %p87_p8, %p81_p5 }
  0x1b   :  { %v57_v2 = vpop.eup %56 }
  0x1c   :  { %v59_v4 = vpop.eup %58  ;;  %v24_v5 = vmul.f32 %v57_v2, %v21_v0 }
  0x1d   :  { %v31_v7 = vmul.f32 %v59_v4, %v22_v1 }
  0x1e   :  { %v26_v8 = vsel %vm25_vm0, %v21_v0, %v24_v5 }
  0x1f   :  { %v29_v9 = vsel %vm27_vm1, %v28_v3, %v26_v8  ;;  %v33_v10 = vsel %vm32_vm2, %v22_v1, %v31_v7 }
  0x20   :  { %37 = vst [vmem:[#allocation5] sm:$0xff] %v29_v9  ;;  %v36_v11 = vsel %vm34_vm3, %v35_v6, %v33_v10 }
  0x21   :  { %38 = vst [vmem:[#allocation5 + $0x8] sm:$0xff] %v36_v11 }
  0x22   :  { %91 = shalt.err (!%p88_p9)
}
  0x23   :  { %48 = dma.vmem_to_hbm [thread:$0]  %s46_s12, 256, %s123_s1, [#allocation4]  }
  0x24   :  { %102 = dma.done.wait [#allocation4], 256  }
  0x25   :  { %103 = vsyncadd [#allocation4], 4294967040 }
  0x26   :  { %52 = vsyncpa [#allocation3], 1 }
  0x27   :  { %53 = vsyncpa [#allocation4], 1 }

</bundles_post_ra>
